<compile_context>
chip_gen: v5e
topology: v5e:2x2
jax: 0.10.0
libtpu: 0.0.40
codegen_flags: <defaults>
</compile_context>

<pallas_src>
import functools

import jax
import jax.numpy as jnp
from jax.experimental import pallas as pl
from jax.experimental.pallas import tpu as pltpu


def _l2_finalize(vlad, eps_sq):
    """Intra-normalize over C, then global L2 over the flat (K*C) tile."""
    inorm_sq = jnp.sum(vlad * vlad, axis=1, keepdims=True)          # (K, 1)
    vlad = vlad * jax.lax.rsqrt(jnp.maximum(inorm_sq, eps_sq))
    fnorm_sq = jnp.sum(vlad * vlad)                                  # scalar
    return vlad * jax.lax.rsqrt(jnp.maximum(fnorm_sq, eps_sq))


def _netvlad_kernel(x_ref, w_ref, b_ref, cent_ref, o_ref, *,
                    n_total, s_total, num_s_blocks, compute_dtype, loop_unroll):
    # torch F.normalize: x / max(||x||, eps), eps=1e-12  ==  x * rsqrt(max(ss, eps^2)).
    eps_sq = 1e-24

    bn, c, ts = x_ref.shape            # activation block: (bN, C, tS)
    n_idx = pl.program_id(0)
    s_idx = pl.program_id(1)

    # Grid-invariant operands, hoisted out of the per-sample loop.
    w = w_ref[...]                     # (K, C)  1x1-conv weight (compute dtype)
    b = b_ref[...]                     # (K, 1)  conv bias, f32 (broadcasts over S)
    cent = cent_ref[...]               # (K, C)  centroids, f32

    # Lane mask for a partial last spatial tile (statically absent when the
    # spatial tiles cover S exactly, which includes the single-tile case).
    needs_s_mask = (num_s_blocks * ts != s_total)
    if needs_s_mask:
        lane = jax.lax.broadcasted_iota(jnp.int32, (1, ts), 1)
        lane_mask = (s_idx * ts + lane) < s_total                    # (1, tS)

    def per_sample(i, carry):
        # cdiv batch grid: skip padded tail samples of the last batch block.
        @pl.when(n_idx * bn + i < n_total)
        def _():
            x = x_ref[i]                                             # (C, tS) native dtype
            xf = x.astype(jnp.float32)

            # 1) descriptor-wise L2 normalization over channels (sublane reduce).
            ss = jnp.sum(xf * xf, axis=0, keepdims=True)             # (1, tS)
            xn = xf * jax.lax.rsqrt(jnp.maximum(ss, eps_sq))         # (C, tS) f32
            if needs_s_mask:
                xn = jnp.where(lane_mask, xn, 0.0)
            xn_mm = xn.astype(compute_dtype)

            # 2) soft assignment: (K,C)@(C,tS) on the MXU, softmax over clusters.
            #    K on sublanes, S lane-dense -> cheap sublane reductions.
            logits = jnp.dot(w, xn_mm,
                             preferred_element_type=jnp.float32) + b  # (K, tS)
            m = jnp.max(logits, axis=0, keepdims=True)
            e = jnp.exp(logits - m)
            a = e * pl.reciprocal(jnp.sum(e, axis=0, keepdims=True),
                                  approx=True)                       # (K, tS)
            if needs_s_mask:
                a = jnp.where(lane_mask, a, 0.0)

            # 3) VLAD contribution of this spatial tile:
            #    sum_s a[k,s]*xn[c,s] - cent[k,c]*sum_s a[k,s].
            #    sum_a is a lane (VPU/XLU) reduction, not an extra MXU pass.
            sum_a = jnp.sum(a, axis=1, keepdims=True)                # (K, 1)
            a_mm = a.astype(compute_dtype)
            contrib = jax.lax.dot_general(
                a_mm, xn_mm, (((1,), (1,)), ((), ())),
                preferred_element_type=jnp.float32) - cent * sum_a   # (K, C) f32

            # 4) accumulate over spatial tiles in the resident output block,
            #    intra-norm over C + global L2 at the last tile.  Exactly one
            #    aligned full-tile (K, C) store per sample per step.
            if num_s_blocks == 1:
                o_ref[i] = _l2_finalize(contrib, eps_sq)
            else:
                @pl.when(s_idx == 0)
                def _():
                    o_ref[i] = contrib

                @pl.when(s_idx > 0)
                def _():
                    o_ref[i] = o_ref[i] + contrib

                @pl.when(s_idx == num_s_blocks - 1)
                def _():
                    o_ref[i] = _l2_finalize(o_ref[i], eps_sq)
        return carry

    jax.lax.fori_loop(0, bn, per_sample, 0, unroll=loop_unroll)


def netvlad_forward(x_nchw, conv_w, conv_b, centroids, *,
                    use_bf16_mxu=False, s_block=None):
    """NetVLAD forward.

    Args:
      x_nchw:    (N, dim, H, W) activations (PyTorch NCHW layout), f32 or bf16.
      conv_w:    (K, dim) 1x1-conv weight  (== conv.weight[:, :, 0, 0]).
      conv_b:    (K,) conv bias.
      centroids: (K, dim) cluster centroids.
      use_bf16_mxu: store/stream x (and the conv weight) as bf16 and feed the
        MXU bf16 operands with f32 accumulation: halves the dominant HBM read.
        Requires ~1e-2 output tolerance.
      s_block:   optional spatial tile override (must be H*W or a multiple of
        128); by default chosen automatically from the VMEM budget.

    Returns:
      (N, K*dim) float32 VLAD descriptors (matches the PyTorch module).
    """
    N, C, H, W = x_nchw.shape
    K = conv_w.shape[0]
    S = H * W
    assert conv_w.shape == (K, C) and centroids.shape == (K, C)

    # HBM storage dtype == MXU compute dtype.  Keep caller bf16 as-is; only
    # cast f32->bf16 here (once) when the bf16 path is requested, so the small
    # array is what actually gets DMA'd from HBM.
    if use_bf16_mxu or x_nchw.dtype == jnp.bfloat16:
        storage_dtype = jnp.bfloat16
    else:
        storage_dtype = jnp.float32
    itemsize = 2 if storage_dtype == jnp.bfloat16 else 4

    # NCHW -> (N, C, S) is a metadata-only reshape (no transpose, no HBM pass).
    x = x_nchw.reshape(N, C, S)
    if x.dtype != storage_dtype:
        x = x.astype(storage_dtype)
    w = conv_w.astype(storage_dtype)              # matmul lhs matches xn's dtype
    b = conv_b.reshape(K, 1).astype(jnp.float32)
    cent = centroids.astype(jnp.float32)

    # Generation-aware VMEM sizing (v5e/v6e: 128 MiB physical, v7x: 64 MiB).
    try:
        vmem_cap = pltpu.get_tpu_info().vmem_capacity_bytes
    except Exception:                              # unknown -> conservative (v7x)
        vmem_cap = 64 * 1024 * 1024
    if vmem_cap >= 96 * 1024 * 1024:               # v5e / v6e
        budget_bytes = 40 * 1024 * 1024
        vmem_limit = 96 * 1024 * 1024
    else:                                          # v7x (or unknown)
        budget_bytes = 12 * 1024 * 1024
        vmem_limit = 32 * 1024 * 1024

    # Spatial tile: whole S when one double-buffered sample fits the budget,
    # otherwise the largest multiple-of-128 tile that does (production-size
    # feature maps, especially on v7x's smaller VMEM).
    if s_block is None:
        in_budget = budget_bytes - 2 * K * C * 4   # reserve the output block
        if 2 * C * S * itemsize <= in_budget:
            s_block = S
        else:
            s_block = (in_budget // (2 * C * itemsize)) // 128 * 128
            s_block = int(min(max(s_block, 128), S))
    assert s_block == S or s_block % 128 == 0, "s_block must be S or a multiple of 128"
    num_s_blocks = pl.cdiv(S, s_block)

    # Batch block: as large as the budget allows (amortizes the ~0.35us
    # per-grid-step overhead), capped so the "parallel" batch axis keeps >= 2
    # grid steps for v7x's two TensorCores.  cdiv grid + in-kernel tail masking
    # keeps bn large for any N (no divisibility requirement).
    per_sample_bytes = 2 * C * s_block * itemsize + 2 * K * C * 4   # dbl-buffered in+out
    bn = 1
    for cand in (64, 32, 16, 8, 4, 2):
        if cand * per_sample_bytes <= budget_bytes:
            bn = cand
            break
    if N >= 2:
        bn = min(bn, pl.cdiv(N, 2))
    bn = max(1, min(bn, N))
    num_n_blocks = pl.cdiv(N, bn)

    kernel = functools.partial(
        _netvlad_kernel,
        n_total=N, s_total=S, num_s_blocks=num_s_blocks,
        compute_dtype=storage_dtype, loop_unroll=min(2, bn))

    out = pl.pallas_call(
        kernel,
        out_shape=jax.ShapeDtypeStruct((N, K, C), jnp.float32),
        grid_spec=pltpu.PrefetchScalarGridSpec(
            num_scalar_prefetch=0,
            grid=(num_n_blocks, num_s_blocks),     # reduction (S) axis innermost
            in_specs=[
                pl.BlockSpec((bn, C, s_block), lambda n, s: (n, 0, s)),
                # Grid-invariant operands (a few KiB; Pallas re-uses the block).
                # Optional: pipeline_mode=pl.Buffered(1) would single-buffer
                # them; skipped — negligible VMEM even at production C=512.
                pl.BlockSpec((K, C), lambda n, s: (0, 0)),
                pl.BlockSpec((K, 1), lambda n, s: (0, 0)),
                pl.BlockSpec((K, C), lambda n, s: (0, 0)),
            ],
            out_specs=pl.BlockSpec((bn, K, C), lambda n, s: (n, 0, 0)),
        ),
        compiler_params=pltpu.CompilerParams(
            # Batch-block axis is independent -> shards across the two
            # TensorCores on v7x; the S axis revisits the output block.
            dimension_semantics=("parallel", "arbitrary"),
            vmem_limit_bytes=vmem_limit),
    )(x, w, b, cent)

    # (N, K, C) -> (N, K*C) is free (row-major, metadata-only).
    return out.reshape(N, K * C)


def _netvlad_ref(x_nchw, conv_w, conv_b, centroids):
    """Pure-JAX reference mirroring the PyTorch module."""
    eps = 1e-12
    N, C, H, W = x_nchw.shape
    x = x_nchw / jnp.maximum(
        jnp.linalg.norm(x_nchw, axis=1, keepdims=True), eps)
    xf = x.reshape(N, C, H * W)                                   # (N, C, S)
    logits = jnp.einsum('kc,ncs->nks', conv_w, xf) + conv_b[None, :, None]
    a = jax.nn.softmax(logits, axis=1)                            # (N, K, S)
    resid = xf[:, None, :, :] - centroids[None, :, :, None]       # (N, K, C, S)
    vlad = jnp.sum(resid * a[:, :, None, :], axis=-1)             # (N, K, C)
    vlad = vlad / jnp.maximum(jnp.linalg.norm(vlad, axis=2, keepdims=True), eps)
    vlad = vlad.reshape(N, -1)
    vlad = vlad / jnp.maximum(jnp.linalg.norm(vlad, axis=1, keepdims=True), eps)
    return vlad


if __name__ == "__main__":
    # NetVLAD(num_clusters=8, dim=128) on a 16x16 feature map, batch 2.
    N, DIM, K, H, W = 2, 128, 8, 16, 16

    key = jax.random.PRNGKey(0)
    k1, k2, k3, k4, k5 = jax.random.split(key, 5)
    x = jax.random.normal(k1, (N, DIM, H, W), dtype=jnp.float32)
    conv_w = jax.random.normal(k2, (K, DIM), dtype=jnp.float32) * 0.1   # 1x1 conv weight
    conv_b = jax.random.normal(k3, (K,), dtype=jnp.float32) * 0.1       # conv bias
    centroids = jax.random.uniform(k4, (K, DIM), dtype=jnp.float32)     # torch.rand init

    ref = _netvlad_ref(x, conv_w, conv_b, centroids)

    # f32 path (single spatial tile, 2 batch grid steps).  Tolerance covers the
    # EUP approximate-reciprocal softmax denominator (~1e-4 relative).
    out = jax.block_until_ready(netvlad_forward(x, conv_w, conv_b, centroids))
    assert out.shape == (N, K * DIM)
    assert jnp.allclose(out, ref, atol=5e-3, rtol=5e-3), "f32 path mismatch"

    # bf16-in-HBM / bf16-MXU path: halves HBM traffic of the dominant x read.
    out_bf16 = jax.block_until_ready(
        netvlad_forward(x, conv_w, conv_b, centroids, use_bf16_mxu=True))
    assert jnp.allclose(out_bf16, ref, atol=2e-2, rtol=2e-2), "bf16 path mismatch"

    # Spatial-tiled path (forced small s_block): odd batch (cdiv + tail mask),
    # S=400 not a multiple of the 128-wide tile (partial-tile lane mask), and
    # output-block accumulation across the "arbitrary" S axis.
    N2, H2, W2 = 3, 20, 20
    x2 = jax.random.normal(k5, (N2, DIM, H2, W2), dtype=jnp.float32)
    ref2 = _netvlad_ref(x2, conv_w, conv_b, centroids)
    out2 = jax.block_until_ready(
        netvlad_forward(x2, conv_w, conv_b, centroids, s_block=128))
    assert out2.shape == (N2, K * DIM)
    assert jnp.allclose(out2, ref2, atol=5e-3, rtol=5e-3), "tiled path mismatch"

    print("KERNEL_OK")
</pallas_src>

<mosaic_0001>
module attributes {stable_mosaic.version = 11 : i64} {
  func.func @_netvlad_kernel(%arg0: i32, %arg1: i32, %arg2: memref<1x128x256xf32, #tpu.memory_space<vmem>>, %arg3: memref<8x128xf32, #tpu.memory_space<vmem>>, %arg4: memref<8x1xf32, #tpu.memory_space<vmem>>, %arg5: memref<8x128xf32, #tpu.memory_space<vmem>>, %arg6: memref<1x8x128xf32, #tpu.memory_space<vmem>>) attributes {dimension_semantics = [#tpu.dimension_semantics<parallel>, #tpu.dimension_semantics<arbitrary>], iteration_bounds = array<i64: 2, 1>, scalar_prefetch = 0 : i64, scratch_operands = 0 : i64, tpu.core_type = #tpu.core_type<tc>, window_params = [{transform_indices = @transform_0, window_bounds = array<i64: 1, 128, 256>}, {pipeline_mode = #tpu.pipeline_mode<synchronous>, transform_indices = @transform_1, window_bounds = array<i64: 8, 128>}, {pipeline_mode = #tpu.pipeline_mode<synchronous>, transform_indices = @transform_2, window_bounds = array<i64: 8, 1>}, {pipeline_mode = #tpu.pipeline_mode<synchronous>, transform_indices = @transform_3, window_bounds = array<i64: 8, 128>}, {transform_indices = @transform_4, window_bounds = array<i64: 1, 8, 128>}]} {
    %c0 = arith.constant 0 : index
    %c0_0 = arith.constant 0 : index
    %0 = vector.load %arg3[%c0, %c0_0] : memref<8x128xf32, #tpu.memory_space<vmem>>, vector<8x128xf32>
    %c0_1 = arith.constant 0 : index
    %c0_2 = arith.constant 0 : index
    %1 = vector.load %arg4[%c0_1, %c0_2] : memref<8x1xf32, #tpu.memory_space<vmem>>, vector<8x1xf32>
    %c0_3 = arith.constant 0 : index
    %c0_4 = arith.constant 0 : index
    %2 = vector.load %arg5[%c0_3, %c0_4] : memref<8x128xf32, #tpu.memory_space<vmem>>, vector<8x128xf32>
    %c0_i32 = arith.constant 0 : i32
    %c1_i32 = arith.constant 1 : i32
    %3 = arith.muli %arg0, %c1_i32 : i32
    %4 = arith.addi %3, %c0_i32 : i32
    %c2_i32 = arith.constant 2 : i32
    %5 = arith.cmpi slt, %4, %c2_i32 : i32
    %6 = arith.extui %5 : i1 to i32
    %c0_i32_5 = arith.constant 0 : i32
    %7 = arith.cmpi ne, %6, %c0_i32_5 : i32
    scf.if %7 {
      %8 = arith.index_cast %c0_i32 : i32 to index
      %c0_7 = arith.constant 0 : index
      %c0_8 = arith.constant 0 : index
      %9 = vector.load %arg2[%8, %c0_7, %c0_8] : memref<1x128x256xf32, #tpu.memory_space<vmem>>, vector<1x128x256xf32>
      %10 = vector.shape_cast %9 : vector<1x128x256xf32> to vector<128x256xf32>
      %11 = arith.mulf %10, %10 : vector<128x256xf32>
      %cst = arith.constant dense<0.000000e+00> : vector<256xf32>
      %12 = vector.multi_reduction <add>, %11, %cst [0] : vector<128x256xf32> to vector<256xf32>
      %13 = vector.shape_cast %12 : vector<256xf32> to vector<1x256xf32>
      %cst_9 = arith.constant 1.000000e-24 : f32
      %14 = vector.broadcast %cst_9 : f32 to vector<1x256xf32>
      %15 = arith.maximumf %13, %14 : vector<1x256xf32>
      %16 = math.rsqrt %15 : vector<1x256xf32>
      %17 = vector.broadcast %16 : vector<1x256xf32> to vector<128x256xf32>
      %18 = arith.mulf %10, %17 : vector<128x256xf32>
      %cst_10 = arith.constant dense<0.000000e+00> : vector<8x256xf32>
      %19 = tpu.matmul %0, %18, %cst_10 {dimension_numbers = #tpu.dot_dimension_numbers<[1], [0], [0], [1], [0, 0, 1, 1], [], []>} : vector<8x128xf32>, vector<128x256xf32>, vector<8x256xf32> -> vector<8x256xf32>
      %20 = vector.broadcast %1 : vector<8x1xf32> to vector<8x256xf32>
      %21 = arith.addf %19, %20 : vector<8x256xf32>
      %cst_11 = arith.constant dense<0xFF800000> : vector<256xf32>
      %22 = vector.multi_reduction <maximumf>, %21, %cst_11 [0] : vector<8x256xf32> to vector<256xf32>
      %23 = vector.shape_cast %22 : vector<256xf32> to vector<1x256xf32>
      %24 = vector.broadcast %23 : vector<1x256xf32> to vector<8x256xf32>
      %25 = arith.subf %21, %24 : vector<8x256xf32>
      %26 = math.exp %25 : vector<8x256xf32>
      %cst_12 = arith.constant dense<0.000000e+00> : vector<256xf32>
      %27 = vector.multi_reduction <add>, %26, %cst_12 [0] : vector<8x256xf32> to vector<256xf32>
      %28 = vector.shape_cast %27 : vector<256xf32> to vector<1x256xf32>
      %29 = tpu.reciprocal %28 {approx = true} : vector<1x256xf32> -> vector<1x256xf32>
      %30 = vector.broadcast %29 : vector<1x256xf32> to vector<8x256xf32>
      %31 = arith.mulf %26, %30 : vector<8x256xf32>
      %cst_13 = arith.constant dense<0.000000e+00> : vector<8xf32>
      %32 = vector.multi_reduction <add>, %31, %cst_13 [1] : vector<8x256xf32> to vector<8xf32>
      %33 = vector.shape_cast %32 : vector<8xf32> to vector<8x1xf32>
      %cst_14 = arith.constant dense<0.000000e+00> : vector<8x128xf32>
      %34 = tpu.matmul %31, %18, %cst_14 {dimension_numbers = #tpu.dot_dimension_numbers<[1], [1], [0], [0], [0, 0, 1, 0], [], []>} : vector<8x256xf32>, vector<128x256xf32>, vector<8x128xf32> -> vector<8x128xf32>
      %35 = vector.broadcast %33 : vector<8x1xf32> to vector<8x128xf32>
      %36 = arith.mulf %2, %35 : vector<8x128xf32>
      %37 = arith.subf %34, %36 : vector<8x128xf32>
      %38 = arith.mulf %37, %37 : vector<8x128xf32>
      %cst_15 = arith.constant dense<0.000000e+00> : vector<8xf32>
      %39 = vector.multi_reduction <add>, %38, %cst_15 [1] : vector<8x128xf32> to vector<8xf32>
      %40 = vector.shape_cast %39 : vector<8xf32> to vector<8x1xf32>
      %cst_16 = arith.constant 1.000000e-24 : f32
      %41 = vector.broadcast %cst_16 : f32 to vector<8x1xf32>
      %42 = arith.maximumf %40, %41 : vector<8x1xf32>
      %43 = math.rsqrt %42 : vector<8x1xf32>
      %44 = vector.broadcast %43 : vector<8x1xf32> to vector<8x128xf32>
      %45 = arith.mulf %37, %44 : vector<8x128xf32>
      %46 = arith.mulf %45, %45 : vector<8x128xf32>
      %47 = vector.shape_cast %46 : vector<8x128xf32> to vector<1x8x128xf32>
      %cst_17 = arith.constant dense<0.000000e+00> : vector<1xf32>
      %48 = vector.multi_reduction <add>, %47, %cst_17 [1, 2] : vector<1x8x128xf32> to vector<1xf32>
      %49 = vector.shape_cast %48 : vector<1xf32> to vector<1x1x1xf32>
      %50 = vector.extract %49[0, 0, 0] : f32 from vector<1x1x1xf32>
      %cst_18 = arith.constant 1.000000e-24 : f32
      %51 = arith.maximumf %50, %cst_18 : f32
      %52 = math.rsqrt %51 : f32
      %53 = vector.broadcast %52 : f32 to vector<8x128xf32>
      %54 = arith.mulf %45, %53 : vector<8x128xf32>
      %55 = arith.index_cast %c0_i32 : i32 to index
      %c0_19 = arith.constant 0 : index
      %c0_20 = arith.constant 0 : index
      %56 = vector.load %arg6[%55, %c0_19, %c0_20] : memref<1x8x128xf32, #tpu.memory_space<vmem>>, vector<1x8x128xf32>
      %57 = vector.shape_cast %56 : vector<1x8x128xf32> to vector<8x128xf32>
      %58 = vector.shape_cast %54 : vector<8x128xf32> to vector<1x8x128xf32>
      tpu.vector_store %arg6[%55, %c0_19, %c0_20], %58 {strides = array<i32>} : memref<1x8x128xf32, #tpu.memory_space<vmem>>, vector<1x8x128xf32>,
    } else {
    }
    %c1_i32_6 = arith.constant 1 : i32
    return
  }
  func.func @transform_0(%arg0: i32, %arg1: i32) -> (i32, i32, i32) {
    %c0_i32 = arith.constant 0 : i32
    %c0_i32_0 = arith.constant 0 : i32
    return %arg0, %c0_i32, %arg1 : i32, i32, i32
  }
  func.func @transform_1(%arg0: i32, %arg1: i32) -> (i32, i32) {
    %c0_i32 = arith.constant 0 : i32
    %c0_i32_0 = arith.constant 0 : i32
    %c0_i32_1 = arith.constant 0 : i32
    return %c0_i32, %c0_i32_0 : i32, i32
  }
  func.func @transform_2(%arg0: i32, %arg1: i32) -> (i32, i32) {
    %c0_i32 = arith.constant 0 : i32
    %c0_i32_0 = arith.constant 0 : i32
    %c0_i32_1 = arith.constant 0 : i32
    return %c0_i32, %c0_i32_0 : i32, i32
  }
  func.func @transform_3(%arg0: i32, %arg1: i32) -> (i32, i32) {
    %c0_i32 = arith.constant 0 : i32
    %c0_i32_0 = arith.constant 0 : i32
    %c0_i32_1 = arith.constant 0 : i32
    return %c0_i32, %c0_i32_0 : i32, i32
  }
  func.func @transform_4(%arg0: i32, %arg1: i32) -> (i32, i32, i32) {
    %c0_i32 = arith.constant 0 : i32
    %c0_i32_0 = arith.constant 0 : i32
    %c0_i32_1 = arith.constant 0 : i32
    return %arg0, %c0_i32, %c0_i32_0 : i32, i32, i32
  }
}

</mosaic_0001>

<bundles_post_ra>
// kernel: tpu_custom_call.1
= control target key start
LH: loop header
LB: loop body
LE: loop exit
PB: predicated region body
PF: predicated region fallthrough
CT: control target
= control target key end

     0   :  { %s1363_s0 = inlined_call_operand.hbm [shape: f32[2,128,256], index: 0, kind: input, shape index: {}]   ;;  %s1364_s1 = inlined_call_operand.vmem [shape: f32[8,128], index: 1, kind: input, shape index: {}]   ;;  %s1365_s2 = inlined_call_operand.vmem [shape: f32[8,1], index: 2, kind: input, shape index: {}]   ;;  %s1366_s3 = inlined_call_operand.hbm [shape: f32[8,128], index: 3, kind: input, shape index: {}]   ;;  %s1367_s4 = inlined_call_operand.hbm [shape: f32[2,8,128], index: 4, kind: output, shape index: {}]  }
   0x1   :  { %1370 = sst [smem:[#allocation12_spill]] %s1366_s3 }
   0x2   :  { %9 = vsyncpa [#allocation3], 0 }
   0x3   :  { %11 = vsyncpa [#allocation3 + $0x1], 0 }
   0x4   :  { %12 = vsyncpa [#allocation6], 0 }
   0x5   :  { %13 = vsyncpa [#allocation4], 0 }
   0x6   :  { %15 = vsyncpa [#allocation4 + $0x1], 0  ;;  %s980_s15 = smov 0   ;;  %s982_s16 = smov 0  }
   0x7   :  { %s984_s17 = smov 0   ;;  %s986_s18 = smov 0  }
   0x8   :  { %s988_s19 = smov 0   ;;  %s990_s20 = smov 0  }
   0x9 LB: > { %1371 = sst [smem:[#allocation11_spill]] %s948_s20  ;;  %s686_s21 = sadd.s32 4294967295, %s948_s20   ;;  %s948_s20 = sphi %s990_s20, %s21_s20   ;;  %s944_s19 = sphi %s988_s19, %s1385_s19   ;;  %s940_s18 = sphi %s986_s18, %s1384_s18   ;;  %s936_s17 = sphi %s984_s17, %s1383_s17   ;;  %s932_s16 = sphi %s982_s16, %s1382_s16   ;;  %s928_s15 = sphi %s980_s15, %s1381_s15  }
   0xa   : > { %s687_s22 = sadd.s32 4294967294, %s948_s20   ;;  %s42_s23 = sadd.s32 1, %s936_s17 }
   0xb   : > { %p49_p0 = scmp.ne.s32.totalorder %s936_s17, %s932_s16  ;;  %p50_p1 = scmp.eq.s32.totalorder %s948_s20, 0 }
   0xc   : > { %p55_p2 = scmp.ne.s32.totalorder %s932_s16, %s928_s15  ;;  %p1018_p3 = scmp.eq.s32.totalorder %s686_s21, 0 }
   0xd   : > { %p142_p4 = scmp.eq.s32.totalorder %s686_s21, 1  ;;  %p1022_p5 = por %p50_p1, %p49_p0 }
   0xe   : > { %p148_p6 = scmp.eq.s32.totalorder %s687_s22, 1  ;;  %p1028_p7 = por %p1018_p3, %p55_p2 }
   0xf   : > { %p1032_p8 = por %p142_p4, %p49_p0  ;;  %p688_p10 = scmp.ge.s32.totalorder %s948_s20, 1 }
  0x10   : > { %p1036_p9 = por %p148_p6, %p55_p2  ;;  %p155_p11 = scmp.lt.s32.totalorder %s948_s20, 3 }
  0x11   : > { %s1377_s3 = sld [smem:[#allocation12_spill]]  ;;  %s950_s7 = smov [#allocation5]  }
  0x12   : > { %p1045_p12 = pnand %p688_p10, %p155_p11  ;;  %s175_s8 = sshll.u32 %s950_s7, 4  ;;  %s176_s8 = int_to_ptr.vmem [resolvable:$true] %s175_s8 }
  0x13   : > { %p690_p13 = scmp.ge.s32.totalorder %s948_s20, 2  ;;  %p729_p1 = scmp.lt.s32.totalorder %s948_s20, 2 }
  0x14   : > { %p716_p0 = pneg %p1045_p12  ;;  %s33_s10 = sadd.s32 1, %s944_s19 }
  0x15   : > { %p1057_p4 = pnand %p729_p1, %p1022_p5  ;;  %p35_p6 = scmp.ge.s32.totalorder %s33_s10, 2 }
  0x16   : > { %p717_p2 = pnand %p716_p0, %p1018_p3  ;;  %s186_s11 = sand.u32 1, %s936_s17  }
  0x17   : > { %s173_s5 = sshll.u32 %s1377_s3, 4  ;;  %s1387_s10 = smov (%p35_p6, %s33_s10), 0  ;;  %s174_s5 = int_to_ptr.hbm [resolvable:$true] %s173_s5 }
  0x18   : > { %719 = dma.hbm_to_vmem [thread:$0]  (!%p717_p2), %s174_s5, 128, %s176_s8, [#allocation6]  }
  0x19   : > { %s691_s12 = sshll.u32 %s186_s11, 8  ;;  %s37_s13 = ssub.s32 %s944_s19, %s1387_s10 }
  0x1a   : > { %p40_p10 = scmp.eq.s32.totalorder %s37_s13, 0  ;;  %s703_s14 = sshll.u32 %s944_s19, 8 }
  0x1b   : > { %s197_s25 = scalar_lea.hbm %s1363_s0, %s703_s14  ;;  %s190_s29 = scalar_lea.vmem [#allocation2], %s691_s12 }
  0x1c   : > { %s200_s30 = sshll.u32 %s190_s29, 4  ;;  %s198_s3 = sshll.u32 %s197_s25, 4  ;;  %s201_s30 = int_to_ptr.vmem [resolvable:$true] %s200_s30  ;;  %s199_s3 = int_to_ptr.hbm [resolvable:$true] %s198_s3 }
  0x1d   : > { %s1074_s7 = scalar_select %p40_p10, %s936_s17, %s42_s23  }
  0x1e   : > { %s187_s5 = scalar_lea.sflag [#allocation3], %s186_s11  ;;  %s951_s8 = smov 256  }
  0x1f   : > { %s952_s20 = smov 16   ;;  %212 = sbr.rel (%p1045_p12) target bundleno = 862 (0x35e), region = 36 }
  0x20   : > { %723 = dma.hbm_to_vmem [thread:$0]  (!%p1057_p4), %s199_s3, 4096, %s201_s30, %s187_s5, %s951_s8, %s951_s8, %s952_s20  }
  0x21   : > { %s1081_s13 = sand.u32 (!%p1045_p12), 1, %s932_s16  }
  0x22   : > { %s695_s12 = sshll.u32 (!%p1045_p12), %s1081_s13, 8  ;;  %s215_s23 = scalar_lea.sflag (!%p1045_p12), [#allocation3], %s1081_s13 }
  0x23   : > { %s1085_s14 = scalar_lea.vmem (!%p1045_p12), [#allocation2], %s695_s12 }
  0x24   : > { %915 = dma.done.wait (%p1028_p7), %s215_s23, 4096  }
  0x25   : > { %917 = vsyncadd (%p1028_p7), %s215_s23, 4294963200 }
  0x26   : > { %919 = dma.done.wait (%p1018_p3), [#allocation6], 128  }
  0x27   : > { %921 = vsyncadd (%p1018_p3), [#allocation6], 4294967168  ;;  %s697_s3 = sshll.u32 %s1081_s13, 3  ;;  %v1099_v0 = vld [vmem:[%s1364_s1] sm:$0xff]  ;;  %p698_p5 = scmp.ge.s32.totalorder %s940_s18, 2 }
  0x28   : > { %v1104_v1 = vld [vmem:[%s1365_s2] sm:$0xff]  ;;  %s1108_s26 = scalar_lea.vmem [#allocation7], %s697_s3  ;;  %s954_s21 = smov (!%p698_p5), 1e-24  }
  0x29   : > { %v1106_v2 = vld [vmem:[#allocation5] sm:$0xff]  ;;  %256 = sbr.rel (%p698_p5) target bundleno = 847 (0x34f), region = 48 }
  0x2e   : > { %v1112_v3 = vld [vmem:[%s1085_s14] sm:$0xff]  ;;  %v1115_v4 = vld [vmem:[%s1085_s14 + $0x10] sm:$0xff]  ;;  %v1140_v16 = vld [vmem:[%s1085_s14 + $0x8] sm:$0xff] }
  0x2f   : > { %v1118_v5 = vld [vmem:[%s1085_s14 + $0x20] sm:$0xff]  ;;  %v1121_v6 = vld [vmem:[%s1085_s14 + $0x30] sm:$0xff]  ;;  %v289_v7 = vmul.f32 %v1112_v3, %v1112_v3  ;;  %v291_v8 = vmul.f32 %v1115_v4, %v1115_v4  ;;  %v1143_v17 = vld [vmem:[%s1085_s14 + $0x18] sm:$0xff]  ;;  %v290_v21 = vmul.f32 %v1140_v16, %v1140_v16 }
  0x30   : > { %v293_v9 = vmul.f32 %v1118_v5, %v1118_v5  ;;  %v1130_v10 = vld [vmem:[%s1085_s14 + $0x40] sm:$0xff]  ;;  %v295_v11 = vmul.f32 %v1121_v6, %v1121_v6  ;;  %v1135_v13 = vld [vmem:[%s1085_s14 + $0x50] sm:$0xff]  ;;  %v1149_v19 = vld [vmem:[%s1085_s14 + $0x28] sm:$0xff]  ;;  %v292_v22 = vmul.f32 %v1143_v17, %v1143_v17 }
  0x31   : > { %v321_v12 = vadd.f32 %v291_v8, %v289_v7  ;;  %v297_v14 = vmul.f32 %v1130_v10, %v1130_v10  ;;  %v1146_v18 = vld [vmem:[%s1085_s14 + $0x60] sm:$0xff]  ;;  %v1152_v20 = vld [vmem:[%s1085_s14 + $0x38] sm:$0xff]  ;;  %v299_v23 = vmul.f32 %v1135_v13, %v1135_v13  ;;  %v1161_v25 = vld [vmem:[%s1085_s14 + $0x48] sm:$0xff]  ;;  %v294_v26 = vmul.f32 %v1149_v19, %v1149_v19 }
  0x32   : > { %v1166_v27 = vld [vmem:[%s1085_s14 + $0x70] sm:$0xff]  ;;  %v296_v28 = vmul.f32 %v1152_v20, %v1152_v20  ;;  %v342_v29 = vadd.f32 %v292_v22, %v290_v21  ;;  %v301_v30 = vmul.f32 %v1146_v18, %v1146_v18  ;;  %v1173_v32 = vld [vmem:[%s1085_s14 + $0x58] sm:$0xff]  ;;  %v1176_v33 = vld [vmem:[%s1085_s14 + $0x80] sm:$0xff]  ;;  %v298_v34 = vmul.f32 %v1161_v25, %v1161_v25 }
  0x33   : > { %v322_v15 = vadd.f32 %v321_v12, %v293_v9  ;;  %v303_v36 = vmul.f32 %v1166_v27, %v1166_v27  ;;  %v1183_v38 = vld [vmem:[%s1085_s14 + $0x68] sm:$0xff]  ;;  %v1186_v39 = vld [vmem:[%s1085_s14 + $0x90] sm:$0xff]  ;;  %v300_v40 = vmul.f32 %v1173_v32, %v1173_v32  ;;  %v305_v42 = vmul.f32 %v1176_v33, %v1176_v33  ;;  %v1193_v44 = vld [vmem:[%s1085_s14 + $0x78] sm:$0xff] }
  0x34   : > { %v343_v35 = vadd.f32 %v342_v29, %v294_v26  ;;  %v1196_v45 = vld [vmem:[%s1085_s14 + $0xa0] sm:$0xff]  ;;  %v302_v46 = vmul.f32 %v1183_v38, %v1183_v38  ;;  %v307_v48 = vmul.f32 %v1186_v39, %v1186_v39  ;;  %v1203_v50 = vld [vmem:[%s1085_s14 + $0x88] sm:$0xff]  ;;  %v1206_v51 = vld [vmem:[%s1085_s14 + $0xb0] sm:$0xff]  ;;  %v304_v52 = vmul.f32 %v1193_v44, %v1193_v44 }
  0x35   : > { %v323_v24 = vadd.f32 %v322_v15, %v295_v11  ;;  %v309_v54 = vmul.f32 %v1196_v45, %v1196_v45  ;;  %v1213_v56 = vld [vmem:[%s1085_s14 + $0x98] sm:$0xff]  ;;  %v1216_v57 = vld [vmem:[%s1085_s14 + $0xc0] sm:$0xff]  ;;  %v306_v58 = vmul.f32 %v1203_v50, %v1203_v50  ;;  %v311_v60 = vmul.f32 %v1206_v51, %v1206_v51  ;;  %v1223_v62 = vld [vmem:[%s1085_s14 + $0xa8] sm:$0xff] }
  0x36   : > { %v344_v41 = vadd.f32 %v343_v35, %v296_v28  ;;  %v1226_v63 = vld [vmem:[%s1085_s14 + $0xd0] sm:$0xff]  ;;  %v308_v7 = vmul.f32 %v1213_v56, %v1213_v56  ;;  %v313_v9 = vmul.f32 %v1216_v57, %v1216_v57  ;;  %v1233_v12 = vld [vmem:[%s1085_s14 + $0xb8] sm:$0xff]  ;;  %v310_v15 = vmul.f32 %v1223_v62, %v1223_v62 }
  0x37   : > { %v324_v31 = vadd.f32 %v323_v24, %v297_v14  ;;  %v285_v14 = vld [vmem:[%s1085_s14 + $0xe0] sm:$0xff]  ;;  %v315_v22 = vmul.f32 %v1226_v63, %v1226_v63  ;;  %v1241_v24 = vld [vmem:[%s1085_s14 + $0xc8] sm:$0xff]  ;;  %v287_v26 = vld [vmem:[%s1085_s14 + $0xf0] sm:$0xff]  ;;  %v312_v28 = vmul.f32 %v1233_v12, %v1233_v12 }
  0x38   : > { %v345_v47 = vadd.f32 %v344_v41, %v298_v34  ;;  %v1247_v34 = vld [vmem:[%s1085_s14 + $0xd8] sm:$0xff]  ;;  %v314_v35 = vmul.f32 %v1241_v24, %v1241_v24  ;;  %v286_v41 = vld [vmem:[%s1085_s14 + $0xe8] sm:$0xff] }
  0x39   : > { %v325_v37 = vadd.f32 %v324_v31, %v299_v23 }
  0x3a   : > { %v346_v53 = vadd.f32 %v345_v47, %v300_v40  ;;  %v288_v47 = vld [vmem:[%s1085_s14 + $0xf8] sm:$0xff] }
  0x3b   : > { %v326_v43 = vadd.f32 %v325_v37, %v301_v30  ;;  %v317_v30 = vmul.f32 %v285_v14, %v285_v14  ;;  %v319_v37 = vmul.f32 %v287_v26, %v287_v26 }
  0x3c   : > { %v347_v59 = vadd.f32 %v346_v53, %v302_v46  ;;  %v320_v53 = vmul.f32 %v288_v47, %v288_v47 }
  0x3d   : > { %v327_v49 = vadd.f32 %v326_v43, %v303_v36 }
  0x3e   : > { %v348_v8 = vadd.f32 %v347_v59, %v304_v52 }
  0x3f   : > { %v328_v55 = vadd.f32 %v327_v49, %v305_v42  ;;  %v316_v42 = vmul.f32 %v1247_v34, %v1247_v34 }
  0x40   : > { %v349_v21 = vadd.f32 %v348_v8, %v306_v58 }
  0x41   : > { %v329_v61 = vadd.f32 %v328_v55, %v307_v48  ;;  %v318_v48 = vmul.f32 %v286_v41, %v286_v41 }
  0x42   : > { %v350_v29 = vadd.f32 %v349_v21, %v308_v7 }
  0x43   : > { %v330_v11 = vadd.f32 %v329_v61, %v309_v54 }
  0x44   : > { %v351_v36 = vadd.f32 %v350_v29, %v310_v15 }
  0x45   : > { %v331_v23 = vadd.f32 %v330_v11, %v311_v60 }
  0x46   : > { %v352_v43 = vadd.f32 %v351_v36, %v312_v28 }
  0x47   : > { %v332_v31 = vadd.f32 %v331_v23, %v313_v9 }
  0x48   : > { %v353_v49 = vadd.f32 %v352_v43, %v314_v35 }
  0x49   : > { %v333_v40 = vadd.f32 %v332_v31, %v315_v22 }
  0x4a   : > { %v354_v54 = vadd.f32 %v353_v49, %v316_v42 }
  0x4b   : > { %v334_v46 = vadd.f32 %v333_v40, %v317_v30 }
  0x4c   : > { %v355_v58 = vadd.f32 %v354_v54, %v318_v48 }
  0x4d   : > { %v335_v52 = vadd.f32 %v334_v46, %v319_v37 }
  0x4e   : > { %v356_v60 = vadd.f32 %v355_v58, %v320_v53 }
  0x4f   : > { %v336_v55 = vrot.slane %v335_v52, 4 }
  0x50   : > { %v357_v7 = vrot.slane %v356_v60, 4 }
  0x51   : > { %v337_v59 = vadd.f32 %v336_v55, %v335_v52 }
  0x52   : > { %v358_v9 = vadd.f32 %v357_v7, %v356_v60 }
  0x53   : > { %v338_v61 = vrot.slane %v337_v59, 2 }
  0x54   : > { %v359_v15 = vrot.slane %v358_v9, 2 }
  0x55   : > { %v339_v8 = vadd.f32 %v338_v61, %v337_v59 }
  0x56   : > { %v360_v22 = vadd.f32 %v359_v15, %v358_v9 }
  0x57   : > { %v340_v11 = vrot.slane %v339_v8, 1 }
  0x58   : > { %v361_v28 = vrot.slane %v360_v22, 1 }
  0x59   : > { %v341_v21 = vadd.f32 %v340_v11, %v339_v8 }
  0x5a   : > { %v362_v29 = vadd.f32 %v361_v28, %v360_v22 }
  0x5b   : > { %v363_v23 = vmax.f32 %v341_v21, 1e-24 }
  0x5c   : > { %v364_v30 = vmax.f32 %v362_v29, 1e-24 }
  0x5d   : > { %786 = vrsqrt.f32 %v363_v23  ;;  %vm371_vm0 = vweird.f32 %v363_v23 }
  0x5e   : > { %788 = vrsqrt.f32 %v364_v30  ;;  %vm381_vm3 = vweird.f32 %v364_v30 }
  0x63   : > { %v787_v31 = vpop.eup %786 }
  0x64   : > { %v366_v35 = vmul.f32 %v787_v31, %v363_v23  ;;  %v789_v37 = vpop.eup %788  ;;  %vm372_vm1 = vweird.f32 %v787_v31 }
  0x65   : > { %v376_v42 = vmul.f32 %v789_v37, %v364_v30  ;;  %vm373_vm2 = vmor %vm371_vm0, %vm372_vm1  ;;  %vm382_vm4 = vweird.f32 %v789_v37 }
  0x66   : > { %v367_v36 = vmul.f32 %v787_v31, %v366_v35  ;;  %vm383_vm5 = vmor %vm381_vm3, %vm382_vm4 }
  0x67   : > { %v377_v46 = vmul.f32 %v789_v37, %v376_v42 }
  0x68   : > { %v368_v40 = vmul.f32 0.5, %v367_v36 }
  0x69   : > { %v378_v49 = vmul.f32 0.5, %v377_v46 }
  0x6a   : > { %v369_v43 = vsub.f32 1.5, %v368_v40 }
  0x6b   : > { %v379_v54 = vsub.f32 1.5, %v378_v49 }
  0x6c   : > { %v370_v48 = vmul.f32 %v787_v31, %v369_v43 }
  0x6d   : > { %v380_v58 = vmul.f32 %v789_v37, %v379_v54 }
  0x6e   : > { %v1255_v52 = vsel %vm373_vm2, %v787_v31, %v370_v48 }
  0x6f   : > { %v415_v53 = vmul.f32 %v1255_v52, %v287_v26  ;;  %v413_v55 = vmul.f32 %v1255_v52, %v285_v14  ;;  %v411_v59 = vmul.f32 %v1255_v52, %v1226_v63  ;;  %v1261_v60 = vsel %vm383_vm5, %v789_v37, %v380_v58 }
  0x70   : > { %v409_v61 = vmul.f32 %v1255_v52, %v1216_v57  ;;  %v416_v7 = vmul.f32 %v1261_v60, %v288_v47  ;;  %v414_v26 = vmul.f32 %v1261_v60, %v286_v41  ;;  %v407_v14 = vmul.f32 %v1255_v52, %v1206_v51 }
  0x71   : > { %422 = vmatpush.msra.mxu0 %v415_v53  ;;  %499 = vmatpush.xpose.msra.mxu2 %v415_v53  ;;  %v412_v8 = vmul.f32 %v1261_v60, %v1247_v34  ;;  %v405_v63 = vmul.f32 %v1255_v52, %v1196_v45  ;;  %v410_v57 = vmul.f32 %v1261_v60, %v1241_v24  ;;  %v953_v47 = vmov 0  }
  0x72   : > { %442 = vmatpush.msra.mxu1 %v416_v7  ;;  %519 = vmatpush.xpose.msra.mxu3 %v416_v7  ;;  %v403_v41 = vmul.f32 %v1255_v52, %v1186_v39  ;;  %v408_v51 = vmul.f32 %v1261_v60, %v1233_v12  ;;  %v401_v45 = vmul.f32 %v1255_v52, %v1176_v33 }
  0x73   : > { %423 = vmatpush.msra.mxu0 %v413_v55  ;;  %785 = vset.pattern.permute.xlu0 %v953_v47  ;;  %v406_v24 = vmul.f32 %v1261_v60, %v1223_v62  ;;  %v399_v39 = vmul.f32 %v1255_v52, %v1166_v27  ;;  %v404_v12 = vmul.f32 %v1261_v60, %v1213_v56 }
  0x74   : > { %443 = vmatpush.msra.mxu1 %v414_v26  ;;  %419 = vperm.xlu0 %785, %v1104_v1   ;;  %v397_v1 = vmul.f32 %v1255_v52, %v1146_v18  ;;  %v402_v33 = vmul.f32 %v1261_v60, %v1203_v50  ;;  %v395_v62 = vmul.f32 %v1255_v52, %v1135_v13 }
  0x75   : > { %424 = vmatpush.msra.mxu0 %v411_v59  ;;  %500 = vmatpush.xpose.msra.mxu2 %v413_v55  ;;  %v400_v27 = vmul.f32 %v1261_v60, %v1193_v44  ;;  %v393_v56 = vmul.f32 %v1255_v52, %v1130_v10  ;;  %v398_v18 = vmul.f32 %v1261_v60, %v1183_v38 }
  0x76   : > { %444 = vmatpush.msra.mxu1 %v412_v8  ;;  %520 = vmatpush.xpose.msra.mxu3 %v414_v26  ;;  %v391_v50 = vmul.f32 %v1255_v52, %v1121_v6  ;;  %v396_v13 = vmul.f32 %v1261_v60, %v1173_v32  ;;  %v389_v44 = vmul.f32 %v1255_v52, %v1118_v5 }
  0x77   : > { %425 = vmatpush.msra.mxu0 %v409_v61  ;;  %v394_v10 = vmul.f32 %v1261_v60, %v1161_v25  ;;  %v387_v38 = vmul.f32 %v1255_v52, %v1115_v4  ;;  %v392_v6 = vmul.f32 %v1261_v60, %v1152_v20  ;;  %v385_v32 = vmul.f32 %v1255_v52, %v1112_v3 }
  0x78   : > { %445 = vmatpush.msra.mxu1 %v410_v57  ;;  %v390_v5 = vmul.f32 %v1261_v60, %v1149_v19  ;;  %v388_v25 = vmul.f32 %v1261_v60, %v1143_v17  ;;  %v386_v4 = vmul.f32 %v1261_v60, %v1140_v16 }
  0x79   : > { %426 = vmatpush.msra.mxu0 %v407_v14  ;;  %501 = vmatpush.xpose.msra.mxu2 %v411_v59 }
  0x7a   : > { %446 = vmatpush.msra.mxu1 %v408_v51  ;;  %521 = vmatpush.xpose.msra.mxu3 %v412_v8 }
  0x7b   : > { %427 = vmatpush.msra.mxu0 %v405_v63 }
  0x7c   : > { %447 = vmatpush.msra.mxu1 %v406_v24 }
  0x7d   : > { %428 = vmatpush.msra.mxu0 %v403_v41  ;;  %502 = vmatpush.xpose.msra.mxu2 %v409_v61 }
  0x7e   : > { %448 = vmatpush.msra.mxu1 %v404_v12  ;;  %522 = vmatpush.xpose.msra.mxu3 %v410_v57 }
  0x7f   : > { %429 = vmatpush.msra.mxu0 %v401_v45 }
  0x80   : > { %449 = vmatpush.msra.mxu1 %v402_v33 }
  0x81   : > { %430 = vmatpush.msra.mxu0 %v399_v39  ;;  %503 = vmatpush.xpose.msra.mxu2 %v407_v14 }
  0x82   : > { %450 = vmatpush.msra.mxu1 %v400_v27  ;;  %523 = vmatpush.xpose.msra.mxu3 %v408_v51 }
  0x83   : > { %431 = vmatpush.msra.mxu0 %v397_v1 }
  0x84   : > { %451 = vmatpush.msra.mxu1 %v398_v18 }
  0x85   : > { %432 = vmatpush.msra.mxu0 %v395_v62  ;;  %504 = vmatpush.xpose.msra.mxu2 %v405_v63 }
  0x86   : > { %452 = vmatpush.msra.mxu1 %v396_v13  ;;  %524 = vmatpush.xpose.msra.mxu3 %v406_v24 }
  0x87   : > { %433 = vmatpush.msra.mxu0 %v393_v56 }
  0x88   : > { %453 = vmatpush.msra.mxu1 %v394_v10 }
  0x89   : > { %434 = vmatpush.msra.mxu0 %v391_v50  ;;  %505 = vmatpush.xpose.msra.mxu2 %v403_v41 }
  0x8a   : > { %454 = vmatpush.msra.mxu1 %v392_v6  ;;  %525 = vmatpush.xpose.msra.mxu3 %v404_v12 }
  0x8b   : > { %435 = vmatpush.msra.mxu0 %v389_v44 }
  0x8c   : > { %455 = vmatpush.msra.mxu1 %v390_v5 }
  0x8d   : > { %436 = vmatpush.msra.mxu0 %v387_v38  ;;  %506 = vmatpush.xpose.msra.mxu2 %v401_v45 }
  0x8e   : > { %456 = vmatpush.msra.mxu1 %v388_v25  ;;  %526 = vmatpush.xpose.msra.mxu3 %v402_v33 }
  0x8f   : > { %437 = vmatpush.msra.mxu0 %v385_v32 }
  0x90   : > { %438 = vmatmul.f32.vlgmr.msra.gmra.mxu0 %v1099_v0  ;;  %457 = vmatpush.msra.mxu1 %v386_v4 }
  0x91   : > { %458 = vmatmul.f32.vlgmr.msra.gmra.mxu1 %v1099_v0  ;;  %507 = vmatpush.xpose.msra.mxu2 %v399_v39 }
  0x92   : > { %527 = vmatpush.xpose.msra.mxu3 %v400_v27 }
  0x95   : > { %508 = vmatpush.xpose.msra.mxu2 %v397_v1 }
  0x96   : > { %528 = vmatpush.xpose.msra.mxu3 %v398_v18 }
  0x99   : > { %509 = vmatpush.xpose.msra.mxu2 %v395_v62 }
  0x9a   : > { %529 = vmatpush.xpose.msra.mxu3 %v396_v13 }
  0x9d   : > { %510 = vmatpush.xpose.msra.mxu2 %v393_v56 }
  0x9e   : > { %530 = vmatpush.xpose.msra.mxu3 %v394_v10 }
  0xa1   : > { %511 = vmatpush.xpose.msra.mxu2 %v391_v50 }
  0xa2   : > { %531 = vmatpush.xpose.msra.mxu3 %v392_v6 }
  0xa5   : > { %512 = vmatpush.xpose.msra.mxu2 %v389_v44 }
  0xa6   : > { %532 = vmatpush.xpose.msra.mxu3 %v390_v5 }
  0xa9   : > { %513 = vmatpush.xpose.msra.mxu2 %v387_v38 }
  0xaa   : > { %533 = vmatpush.xpose.msra.mxu3 %v388_v25 }
  0xad   : > { %514 = vmatpush.xpose.msra.mxu2 %v385_v32 }
  0xae   : > { %534 = vmatpush.xpose.msra.mxu3 %v386_v4 }
  0xe6   : > { %v420_v3 = vpop.permute.xlu0 %419 }
 0x10d   : > { %v439_v16 = vpop.f32.mrf.mxu0 }
 0x10e   : > { %v440_v0 = vadd.f32 %v439_v16, %v420_v3  ;;  %v459_v20 = vpop.f32.mrf.mxu1 }
 0x10f   : > { %v460_v34 = vadd.f32 %v459_v20, %v420_v3 }
 0x110   : > { %v462_v17 = vrot.slane %v440_v0, 4 }
 0x111   : > { %v468_v11 = vrot.slane %v460_v34, 4 }
 0x112   : > { %v463_v19 = vmax.f32 %v440_v0, %v462_v17 }
 0x113   : > { %v469_v21 = vmax.f32 %v460_v34, %v468_v11 }
 0x114   : > { %v464_v9 = vrot.slane %v463_v19, 2 }
 0x115   : > { %v470_v23 = vrot.slane %v469_v21, 2 }
 0x116   : > { %v465_v15 = vmax.f32 %v463_v19, %v464_v9 }
 0x117   : > { %v471_v29 = vmax.f32 %v469_v21, %v470_v23 }
 0x118   : > { %v466_v22 = vrot.slane %v465_v15, 1 }
 0x119   : > { %v472_v31 = vrot.slane %v471_v29, 1 }
 0x11a   : > { %v467_v28 = vmax.f32 %v465_v15, %v466_v22 }
 0x11b   : > { %v473_v36 = vmax.f32 %v471_v29, %v472_v31 }
 0x11c   : > { %v474_v30 = vsub.f32 %v440_v0, %v467_v28 }
 0x11d   : > { %v475_v37 = vsub.f32 %v460_v34, %v473_v36 }
 0x11e   : > { %v476_v35 = vmul.f32 1.442695, %v474_v30 }
 0x11f   : > { %v478_v40 = vmul.f32 1.442695, %v475_v37 }
 0x120   : > { %790 = vpow2.f32 %v476_v35 }
 0x121   : > { %792 = vpow2.f32 %v478_v40 }
 0x126   : > { %v791_v42 = vpop.eup %790 }
 0x127   : > { %v480_v43 = vrot.slane %v791_v42, 4  ;;  %v793_v48 = vpop.eup %792 }
 0x128   : > { %v486_v52 = vrot.slane %v793_v48, 4 }
 0x129   : > { %v481_v46 = vadd.f32 %v791_v42, %v480_v43 }
 0x12a   : > { %v487_v54 = vadd.f32 %v793_v48, %v486_v52 }
 0x12b   : > { %v482_v49 = vrot.slane %v481_v46, 2 }
 0x12c   : > { %v488_v58 = vrot.slane %v487_v54, 2 }
 0x12d   : > { %v483_v53 = vadd.f32 %v482_v49, %v481_v46 }
 0x12e   : > { %v489_v60 = vadd.f32 %v488_v58, %v487_v54 }
 0x12f   : > { %v484_v55 = vrot.slane %v483_v53, 1 }
 0x130   : > { %v490_v61 = vrot.slane %v489_v60, 1 }
 0x131   : > { %v485_v59 = vadd.f32 %v484_v55, %v483_v53 }
 0x132   : > { %v491_v7 = vadd.f32 %v490_v61, %v489_v60 }
 0x133   : > { %794 = vrcp.f32 %v485_v59 }
 0x134   : > { %796 = vrcp.f32 %v491_v7 }
 0x139   : > { %v795_v26 = vpop.eup %794 }
 0x13a   : > { %v494_v14 = vmul.f32 %v795_v26, %v791_v42  ;;  %v797_v8 = vpop.eup %796 }
 0x13b   : > { %v495_v63 = vmul.f32 %v797_v8, %v793_v48 }
 0x13c   : > { %515 = vmatmul.f32.vlgmr.msra.gmra.mxu2 %v494_v14 }
 0x13d   : > { %535 = vmatmul.f32.vlgmr.msra.gmra.mxu3 %v495_v63  ;;  %v496_v57 = vadd.f32 %v495_v63, %v494_v14 }
 0x13f   : > { %497 = vadd.xlane.f32.xlu0 %v496_v57 }
 0x1b2   : > { %v498_v41 = vpop.xlane.xlu0 %497 }
 0x1b3   : > { %v539_v45 = vmul.f32 %v498_v41, %v1106_v2 }
 0x1bf   : > { %v516_v47 = vpop.f32.mrf.mxu2 }
 0x1c0   : > { %v536_v51 = vpop.f32.mrf.mxu3 }
 0x1c1   : > { %v537_v24 = vadd.f32 %v536_v51, %v516_v47 }
 0x1c3   : > { %v540_v39 = vsub.f32 %v537_v24, %v539_v45 }
 0x1c5   : > { %v541_v12 = vmul.f32 %v540_v39, %v540_v39 }
 0x1c7   : > { %542 = vadd.xlane.f32.xlu1 %v541_v12 }
 0x23a   : > { %v543_v1 = vpop.xlane.xlu1 %542 }
 0x23b   : > { %v544_v33 = vmax.f32 %v543_v1, 1e-24 }
 0x23d   : > { %798 = vrsqrt.f32 %v544_v33  ;;  %vm551_vm7 = vweird.f32 %v544_v33 }
 0x243   : > { %v799_v62 = vpop.eup %798 }
 0x244   : > { %v546_v27 = vmul.f32 %v799_v62, %v544_v33  ;;  %vm552_vm6 = vweird.f32 %v799_v62 }
 0x245   : > { %vm553_vm8 = vmor %vm551_vm7, %vm552_vm6 }
 0x246   : > { %v547_v56 = vmul.f32 %v799_v62, %v546_v27 }
 0x248   : > { %v548_v18 = vmul.f32 0.5, %v547_v56 }
 0x24a   : > { %v549_v50 = vsub.f32 1.5, %v548_v18 }
 0x24c   : > { %v550_v13 = vmul.f32 %v799_v62, %v549_v50 }
 0x24e   : > { %v554_v44 = vsel %vm553_vm8, %v799_v62, %v550_v13 }
 0x24f   : > { %v555_v10 = vmul.f32 %v554_v44, %v540_v39 }
 0x251   : > { %v556_v38 = vmul.f32 %v555_v10, %v555_v10 }
 0x253   : > { %557 = vadd.xlane.f32.xlu1 %v556_v38 }
 0x2c6   : > { %v558_v2 = vpop.xlane.xlu1 %557 }
 0x2c7   : > { %v559_v6 = vrot.slane %v558_v2, 4 }
 0x2c9   : > { %v560_v32 = vadd.f32 %v559_v6, %v558_v2 }
 0x2cb   : > { %v561_v5 = vrot.slane %v560_v32, 2 }
 0x2cd   : > { %v562_v25 = vadd.f32 %v561_v5, %v560_v32 }
 0x2cf   : > { %v563_v4 = vrot.slane %v562_v25, 1 }
 0x2d1   : > { %v564_v3 = vadd.f32 %v563_v4, %v562_v25 }
 0x2d3   : > { %704 = vpush %v564_v3 }
 0x304   : > { %s705_s24 = spop %704 }
 0x305   : > { %s566_s22 = smax.f32 %s954_s21, %s705_s24 }
 0x306   : > { %v567_v16 = vstv %s566_s22 }
 0x307   : > { %800 = vrsqrt.f32 %v567_v16  ;;  %vm574_vm10 = vweird.f32 %v567_v16 }
 0x30d   : > { %v801_v0 = vpop.eup %800 }
 0x30e   : > { %v569_v17 = vmul.f32 %v801_v0, %v567_v16  ;;  %vm575_vm9 = vweird.f32 %v801_v0 }
 0x30f   : > { %vm576_vm11 = vmor %vm574_vm10, %vm575_vm9 }
 0x310   : > { %v570_v19 = vmul.f32 %v801_v0, %v569_v17 }
 0x312   : > { %v571_v20 = vmul.f32 0.5, %v570_v19 }
 0x314   : > { %v572_v34 = vsub.f32 1.5, %v571_v20 }
 0x316   : > { %v573_v9 = vmul.f32 %v801_v0, %v572_v34 }
 0x318   : > { %v577_v11 = vsel %vm576_vm11, %v801_v0, %v573_v9 }
 0x319   : > { %706 = vpush %v577_v11 }
 0x34a   : > { %s707_s25 = spop %706 }
 0x34b   : > { %v579_v15 = vstv %s707_s25 }
 0x34c   : > { %v580_v21 = vmul.f32 %v579_v15, %v555_v10 }
 0x34e   : > { %581 = vst [vmem:[%s1108_s26] sm:$0xff] %v580_v21 }
 0x34f PF: > { %s700_s29 = sshll.u32 %s940_s18, 3  ;;  %s595_s12 = sshll.u32 %s1108_s26, 4  ;;  %s596_s12 = int_to_ptr.vmem [resolvable:$true] %s595_s12 }
 0x350   : > { %s593_s8 = scalar_lea.hbm %s1367_s4, %s700_s29  ;;  %s583_s14 = scalar_lea.sflag [#allocation4], %s1081_s13 }
 0x351   : > { %s597_s23 = sshll.u32 %s593_s8, 4  ;;  %s882_s18 = scalar_lea.hbm %s1367_s4, 16  ;;  %s598_s23 = int_to_ptr.hbm [resolvable:$true] %s597_s23 }
 0x352   : > { %s876_s3 = sshra.s32 %s598_s23, 4  ;;  %s877_s3 = int_to_ptr.hbm [resolvable:$true] %s876_s3 }
 0x353   : > { %s878_s20 = scalar_lea.hbm %s877_s3, 8  ;;  %p883_p12 = scmp.lt.s32.totalorder %s877_s3, %s1367_s4 }
 0x354   : > { %p879_p3 = scmp.ne.s32.totalorder %s877_s3, %s878_s20  ;;  %p884_p0 = scmp.lt.s32.totalorder %s882_s18, %s878_s20 }
 0x356   : > { %p880_p7 = pnand %p879_p3, %p1032_p8  ;;  %p885_p1 = por %p884_p0, %p883_p12 }
 0x358   : > { %p881_p11 = pneg %p880_p7 }
 0x35a   : > { %p886_p2 = pnand %p885_p1, %p881_p11 }
 0x35c   : > { %889 = shalt.err (!%p886_p2)
}
 0x35d   : > { %714 = dma.vmem_to_hbm [thread:$0]  (%p1032_p8), %s596_s12, 128, %s598_s23, %s583_s14  }
 0x35e PF: > { %s1380_s13 = sld [smem:[#allocation11_spill]]  ;;  %s609_s26 = sand.u32 1, %s928_s15  }
 0x35f   : > { %p725_p4 = pnand %p690_p13, %p1036_p9  ;;  %s610_s21 = scalar_lea.sflag [#allocation4], %s609_s26 }
 0x361   : > { %p726_p6 = pneg %p725_p4 }
 0x363   : > { %923 = dma.done.wait (%p726_p6), %s610_s21, 128  }
 0x364   : > { %925 = vsyncadd (%p726_p6), %s610_s21, 4294967168  ;;  %s21_s20 = sadd.s32 1, %s1380_s13   ;;  %s1381_s15 = smov %s932_s16 }
 0x365   : > { %p18_p10 = scmp.ge.s32.totalorder %s21_s20, 4   ;;  %s1382_s16 = smov %s936_s17 }
 0x366   : > { %s1383_s17 = smov %s1074_s7  ;;  %s1384_s18 = smov %s944_s19 }
 0x367   : > { %s1385_s19 = smov %s1387_s10  ;;  %20 = sbr.rel (!%p18_p10) target bundleno = 9 (0x9), region = 89 }
 0x36c   :  { %616 = vsyncpa [#allocation3], 1 }
 0x36d   :  { %618 = vsyncpa [#allocation3 + $0x1], 1 }
 0x36e   :  { %619 = vsyncpa [#allocation6], 1 }
 0x36f   :  { %620 = vsyncpa [#allocation4], 1 }
 0x370   :  { %622 = vsyncpa [#allocation4 + $0x1], 1 }

</bundles_post_ra>
